<compile_context>
chip_gen: v7x
topology: tpu7x:2x2x1
jax: 0.10.0
libtpu: 0.0.40
codegen_flags: <defaults>
</compile_context>

<pallas_src>
import numpy as np
import jax
import jax.numpy as jnp
from jax.experimental import pallas as pl
from jax.experimental.pallas import tpu as pltpu

HIDDEN = 3
SUB = 8        # sublane padding of the feature dim (3 -> 8)
LANES = 128    # lane padding of the batch dim  (B -> 128)


# ---------------------------------------------------------------------------
# Pallas kernel: whole packed-sequence recurrence in one invocation.
# ---------------------------------------------------------------------------
def rnn_kernel(bs_ref, w_ref, x_ref, o_ref):
    """bs_ref: (T,) int32 SMEM     w_ref: (2,) f32 SMEM  (w1, w2)
       x_ref : (T, SUB, LANES) f32 VMEM  (features on sublanes, batch on lanes)
       o_ref : (SUB, LANES)    f32 VMEM  (final hidden, same layout)"""
    T = x_ref.shape[0]
    w1 = w_ref[0]
    w2 = w_ref[1]
    # loop-invariant lane ids (hoisted; JAX does not CSE iota inside the loop)
    lane_ids = jax.lax.broadcasted_iota(jnp.int32, (SUB, LANES), 1)

    def step(t, h):
        size = bs_ref[t]                  # packed-sequence batch size at step t
        x = x_ref[t]                      # (SUB, LANES); padded rows/lanes are 0
        h0 = h[0:1, :]
        h1 = h[1:2, :]
        h2 = h[2:3, :]
        # hidden @ W.T with W = [[w1,0,0],[w2,1,-1],[1,0,0]]  -> 3 VPU row ops.
        hw = jnp.concatenate(
            [w1 * h0, w2 * h0 + h1 - h2, h0, h[3:, :]], axis=0)   # (SUB, LANES)
        new_h = jnp.maximum(x + hw, 0.0)  # relu(b + hidden[:size] @ W.T)
        # lanes >= size keep their previous hidden state (packed-sequence carry)
        return jnp.where(lane_ids < size, new_h, h)

    h_final = jax.lax.fori_loop(
        0, T, step, jnp.zeros((SUB, LANES), jnp.float32), unroll=T <= 64)
    o_ref[...] = h_final


# ---------------------------------------------------------------------------
# Wrapper: builds inputs exactly like the torch module, pads/packs, calls kernel.
# ---------------------------------------------------------------------------
def rnn_fixed_weights(packed_data, batch_sizes, unsort_idxs, w1, w2):
    batch_sizes = np.asarray(batch_sizes, dtype=np.int32)
    T = int(batch_sizes.shape[0])
    B = int(batch_sizes[0])
    H = HIDDEN
    assert B <= LANES and H <= SUB

    # --- packed -> padded time-major (host-side glue; batch_sizes is metadata) ---
    # layout: x_pad[t, k, b] = feature k of batch-slot b at time t
    offs = np.concatenate([[0], np.cumsum(batch_sizes)])
    pd = np.asarray(packed_data, np.float32)
    x_pad = np.zeros((T, SUB, LANES), np.float32)
    for t in range(T):
        x_pad[t, :H, :batch_sizes[t]] = pd[offs[t]:offs[t + 1]].T
    x_pad = jnp.asarray(x_pad)

    wvec = jnp.concatenate([
        jnp.ravel(jnp.asarray(w1)).astype(jnp.float32),
        jnp.ravel(jnp.asarray(w2)).astype(jnp.float32)])            # (2,)

    out = pl.pallas_call(
        rnn_kernel,
        out_shape=jax.ShapeDtypeStruct((SUB, LANES), jnp.float32),
        grid=(1,),
        in_specs=[
            pl.BlockSpec(memory_space=pltpu.MemorySpace.SMEM),      # batch_sizes
            pl.BlockSpec(memory_space=pltpu.MemorySpace.SMEM),      # (w1, w2)
            pl.BlockSpec((T, SUB, LANES), lambda i: (0, 0, 0)),     # whole sequence
        ],
        out_specs=pl.BlockSpec((SUB, LANES), lambda i: (0, 0)),
        compiler_params=pltpu.CompilerParams(
            dimension_semantics=("arbitrary",)),
    )(jnp.asarray(batch_sizes, jnp.int32), wvec, x_pad)

    hidden = out[:H, :B].T                                          # (B, 3)
    hidden = hidden[jnp.asarray(unsort_idxs, jnp.int32)]            # unsort (glue)
    return None, hidden[None, ...]                                  # (1, B, 3)


# ---------------------------------------------------------------------------
# Pure-numpy reference replicating the torch forward loop exactly.
# ---------------------------------------------------------------------------
def reference(packed_data, batch_sizes, unsort_idxs, w1, w2):
    W = np.array([[0.0, 0.0], [1.0, -1.0], [0.0, 0.0]], np.float32)
    W_pre = np.concatenate([np.ravel(w1), np.ravel(w2), [1.0]]).astype(np.float32).reshape(-1, 1)
    W = np.concatenate([W_pre, W], axis=1)                  # (3, 3)
    bs = np.asarray(batch_sizes)
    offs = np.concatenate([[0], np.cumsum(bs)])
    hidden = np.zeros((bs[0], HIDDEN), np.float32)
    for t, size in enumerate(bs):
        b = np.asarray(packed_data, np.float32)[offs[t]:offs[t + 1]]
        chunk = np.maximum(b + hidden[:size] @ W.T, 0.0)
        hidden = np.concatenate([chunk, hidden[size:]], axis=0)
    hidden = hidden[np.asarray(unsort_idxs)]
    return hidden[None]


if __name__ == "__main__":
    key = jax.random.PRNGKey(0)
    k_seq, k_w1, k_w2 = jax.random.split(key, 3)

    # 4 sequences, feature dim 3, lengths sorted descending (packed-sequence convention)
    lengths = [8, 6, 5, 3]
    B, T, H = len(lengths), max(lengths), HIDDEN
    seqs = np.asarray(jax.random.normal(k_seq, (B, T, H), dtype=jnp.float32))

    # batch_sizes[t] = number of sequences with length > t
    batch_sizes = np.array([sum(1 for L in lengths if L > t) for t in range(T)], np.int32)
    # packed data: at each time step, rows of the first batch_sizes[t] (longest) sequences
    packed_data = np.concatenate(
        [seqs[:batch_sizes[t], t, :] for t in range(T)], axis=0).astype(np.float32)
    unsort_idxs = np.array([2, 0, 3, 1], np.int32)   # arbitrary fixed unsort permutation

    w1 = jax.random.normal(k_w1, (1,), dtype=jnp.float32)
    w2 = jax.random.normal(k_w2, (1,), dtype=jnp.float32)

    _, hidden = rnn_fixed_weights(packed_data, batch_sizes, unsort_idxs, w1, w2)
    hidden = jax.block_until_ready(hidden)

    ref = reference(packed_data, batch_sizes, unsort_idxs, np.asarray(w1), np.asarray(w2))
    np.testing.assert_allclose(np.asarray(hidden), ref, rtol=1e-5, atol=1e-5)
    assert hidden.shape == (1, B, HIDDEN)
    print("KERNEL_OK")
</pallas_src>

<mosaic_0001>
module attributes {stable_mosaic.version = 11 : i64} {
  func.func @rnn_kernel(%arg0: i32, %arg1: memref<8xi32, #tpu.memory_space<smem>>, %arg2: memref<2xf32, #tpu.memory_space<smem>>, %arg3: memref<8x8x128xf32, #tpu.memory_space<vmem>>, %arg4: memref<8x128xf32, #tpu.memory_space<vmem>>) attributes {dimension_semantics = [#tpu.dimension_semantics<arbitrary>], iteration_bounds = array<i64: 1>, scalar_prefetch = 0 : i64, scratch_operands = 0 : i64, tpu.core_type = #tpu.core_type<tc>, window_params = [{transform_indices = @transform_0, window_bounds = array<i64: 8>}, {transform_indices = @transform_1, window_bounds = array<i64: 2>}, {pipeline_mode = #tpu.pipeline_mode<synchronous>, transform_indices = @transform_2, window_bounds = array<i64: 8, 8, 128>}, {pipeline_mode = #tpu.pipeline_mode<synchronous>, transform_indices = @transform_3, window_bounds = array<i64: 8, 128>}]} {
    %c0 = arith.constant 0 : index
    %0 = memref.load %arg2[%c0] : memref<2xf32, #tpu.memory_space<smem>>
    %c1 = arith.constant 1 : index
    %1 = memref.load %arg2[%c1] : memref<2xf32, #tpu.memory_space<smem>>
    %2 = tpu.iota {dimensions = array<i32: 1>} : vector<8x128xi32>
    %cst = arith.constant 0.000000e+00 : f32
    %3 = vector.broadcast %cst : f32 to vector<8x128xf32>
    %c0_i32 = arith.constant 0 : i32
    %4 = arith.index_cast %c0_i32 : i32 to index
    %5 = memref.load %arg1[%4] : memref<8xi32, #tpu.memory_space<smem>>
    %6 = arith.index_cast %c0_i32 : i32 to index
    %c0_0 = arith.constant 0 : index
    %c0_1 = arith.constant 0 : index
    %7 = vector.load %arg3[%6, %c0_0, %c0_1] : memref<8x8x128xf32, #tpu.memory_space<vmem>>, vector<1x8x128xf32>
    %8 = vector.shape_cast %7 : vector<1x8x128xf32> to vector<8x128xf32>
    %9 = vector.extract_strided_slice %3 {offsets = [0, 0], sizes = [1, 128], strides = [1, 1]} : vector<8x128xf32> to vector<1x128xf32>
    %10 = vector.extract_strided_slice %3 {offsets = [1, 0], sizes = [1, 128], strides = [1, 1]} : vector<8x128xf32> to vector<1x128xf32>
    %11 = vector.extract_strided_slice %3 {offsets = [2, 0], sizes = [1, 128], strides = [1, 1]} : vector<8x128xf32> to vector<1x128xf32>
    %12 = vector.broadcast %0 : f32 to vector<1x128xf32>
    %13 = arith.mulf %12, %9 : vector<1x128xf32>
    %14 = vector.broadcast %1 : f32 to vector<1x128xf32>
    %15 = arith.mulf %14, %9 : vector<1x128xf32>
    %16 = arith.addf %15, %10 : vector<1x128xf32>
    %17 = arith.subf %16, %11 : vector<1x128xf32>
    %18 = vector.extract_strided_slice %3 {offsets = [3, 0], sizes = [5, 128], strides = [1, 1]} : vector<8x128xf32> to vector<5x128xf32>
    %19 = tpu.concatenate %13, %17, %9, %18 in 0 : vector<1x128xf32>, vector<1x128xf32>, vector<1x128xf32>, vector<5x128xf32> -> vector<8x128xf32>
    %20 = arith.addf %8, %19 : vector<8x128xf32>
    %cst_2 = arith.constant 0.000000e+00 : f32
    %21 = vector.broadcast %cst_2 : f32 to vector<8x128xf32>
    %22 = arith.maximumf %20, %21 : vector<8x128xf32>
    %23 = vector.broadcast %5 : i32 to vector<8x128xi32>
    %24 = arith.cmpi slt, %2, %23 : vector<8x128xi32>
    %25 = arith.select %24, %22, %3 : vector<8x128xi1>, vector<8x128xf32>
    %c1_i32 = arith.constant 1 : i32
    %26 = arith.index_cast %c1_i32 : i32 to index
    %27 = memref.load %arg1[%26] : memref<8xi32, #tpu.memory_space<smem>>
    %28 = arith.index_cast %c1_i32 : i32 to index
    %c0_3 = arith.constant 0 : index
    %c0_4 = arith.constant 0 : index
    %29 = vector.load %arg3[%28, %c0_3, %c0_4] : memref<8x8x128xf32, #tpu.memory_space<vmem>>, vector<1x8x128xf32>
    %30 = vector.shape_cast %29 : vector<1x8x128xf32> to vector<8x128xf32>
    %31 = vector.extract_strided_slice %25 {offsets = [0, 0], sizes = [1, 128], strides = [1, 1]} : vector<8x128xf32> to vector<1x128xf32>
    %32 = vector.extract_strided_slice %25 {offsets = [1, 0], sizes = [1, 128], strides = [1, 1]} : vector<8x128xf32> to vector<1x128xf32>
    %33 = vector.extract_strided_slice %25 {offsets = [2, 0], sizes = [1, 128], strides = [1, 1]} : vector<8x128xf32> to vector<1x128xf32>
    %34 = vector.broadcast %0 : f32 to vector<1x128xf32>
    %35 = arith.mulf %34, %31 : vector<1x128xf32>
    %36 = vector.broadcast %1 : f32 to vector<1x128xf32>
    %37 = arith.mulf %36, %31 : vector<1x128xf32>
    %38 = arith.addf %37, %32 : vector<1x128xf32>
    %39 = arith.subf %38, %33 : vector<1x128xf32>
    %40 = vector.extract_strided_slice %25 {offsets = [3, 0], sizes = [5, 128], strides = [1, 1]} : vector<8x128xf32> to vector<5x128xf32>
    %41 = tpu.concatenate %35, %39, %31, %40 in 0 : vector<1x128xf32>, vector<1x128xf32>, vector<1x128xf32>, vector<5x128xf32> -> vector<8x128xf32>
    %42 = arith.addf %30, %41 : vector<8x128xf32>
    %cst_5 = arith.constant 0.000000e+00 : f32
    %43 = vector.broadcast %cst_5 : f32 to vector<8x128xf32>
    %44 = arith.maximumf %42, %43 : vector<8x128xf32>
    %45 = vector.broadcast %27 : i32 to vector<8x128xi32>
    %46 = arith.cmpi slt, %2, %45 : vector<8x128xi32>
    %47 = arith.select %46, %44, %25 : vector<8x128xi1>, vector<8x128xf32>
    %c2_i32 = arith.constant 2 : i32
    %48 = arith.index_cast %c2_i32 : i32 to index
    %49 = memref.load %arg1[%48] : memref<8xi32, #tpu.memory_space<smem>>
    %50 = arith.index_cast %c2_i32 : i32 to index
    %c0_6 = arith.constant 0 : index
    %c0_7 = arith.constant 0 : index
    %51 = vector.load %arg3[%50, %c0_6, %c0_7] : memref<8x8x128xf32, #tpu.memory_space<vmem>>, vector<1x8x128xf32>
    %52 = vector.shape_cast %51 : vector<1x8x128xf32> to vector<8x128xf32>
    %53 = vector.extract_strided_slice %47 {offsets = [0, 0], sizes = [1, 128], strides = [1, 1]} : vector<8x128xf32> to vector<1x128xf32>
    %54 = vector.extract_strided_slice %47 {offsets = [1, 0], sizes = [1, 128], strides = [1, 1]} : vector<8x128xf32> to vector<1x128xf32>
    %55 = vector.extract_strided_slice %47 {offsets = [2, 0], sizes = [1, 128], strides = [1, 1]} : vector<8x128xf32> to vector<1x128xf32>
    %56 = vector.broadcast %0 : f32 to vector<1x128xf32>
    %57 = arith.mulf %56, %53 : vector<1x128xf32>
    %58 = vector.broadcast %1 : f32 to vector<1x128xf32>
    %59 = arith.mulf %58, %53 : vector<1x128xf32>
    %60 = arith.addf %59, %54 : vector<1x128xf32>
    %61 = arith.subf %60, %55 : vector<1x128xf32>
    %62 = vector.extract_strided_slice %47 {offsets = [3, 0], sizes = [5, 128], strides = [1, 1]} : vector<8x128xf32> to vector<5x128xf32>
    %63 = tpu.concatenate %57, %61, %53, %62 in 0 : vector<1x128xf32>, vector<1x128xf32>, vector<1x128xf32>, vector<5x128xf32> -> vector<8x128xf32>
    %64 = arith.addf %52, %63 : vector<8x128xf32>
    %cst_8 = arith.constant 0.000000e+00 : f32
    %65 = vector.broadcast %cst_8 : f32 to vector<8x128xf32>
    %66 = arith.maximumf %64, %65 : vector<8x128xf32>
    %67 = vector.broadcast %49 : i32 to vector<8x128xi32>
    %68 = arith.cmpi slt, %2, %67 : vector<8x128xi32>
    %69 = arith.select %68, %66, %47 : vector<8x128xi1>, vector<8x128xf32>
    %c3_i32 = arith.constant 3 : i32
    %70 = arith.index_cast %c3_i32 : i32 to index
    %71 = memref.load %arg1[%70] : memref<8xi32, #tpu.memory_space<smem>>
    %72 = arith.index_cast %c3_i32 : i32 to index
    %c0_9 = arith.constant 0 : index
    %c0_10 = arith.constant 0 : index
    %73 = vector.load %arg3[%72, %c0_9, %c0_10] : memref<8x8x128xf32, #tpu.memory_space<vmem>>, vector<1x8x128xf32>
    %74 = vector.shape_cast %73 : vector<1x8x128xf32> to vector<8x128xf32>
    %75 = vector.extract_strided_slice %69 {offsets = [0, 0], sizes = [1, 128], strides = [1, 1]} : vector<8x128xf32> to vector<1x128xf32>
    %76 = vector.extract_strided_slice %69 {offsets = [1, 0], sizes = [1, 128], strides = [1, 1]} : vector<8x128xf32> to vector<1x128xf32>
    %77 = vector.extract_strided_slice %69 {offsets = [2, 0], sizes = [1, 128], strides = [1, 1]} : vector<8x128xf32> to vector<1x128xf32>
    %78 = vector.broadcast %0 : f32 to vector<1x128xf32>
    %79 = arith.mulf %78, %75 : vector<1x128xf32>
    %80 = vector.broadcast %1 : f32 to vector<1x128xf32>
    %81 = arith.mulf %80, %75 : vector<1x128xf32>
    %82 = arith.addf %81, %76 : vector<1x128xf32>
    %83 = arith.subf %82, %77 : vector<1x128xf32>
    %84 = vector.extract_strided_slice %69 {offsets = [3, 0], sizes = [5, 128], strides = [1, 1]} : vector<8x128xf32> to vector<5x128xf32>
    %85 = tpu.concatenate %79, %83, %75, %84 in 0 : vector<1x128xf32>, vector<1x128xf32>, vector<1x128xf32>, vector<5x128xf32> -> vector<8x128xf32>
    %86 = arith.addf %74, %85 : vector<8x128xf32>
    %cst_11 = arith.constant 0.000000e+00 : f32
    %87 = vector.broadcast %cst_11 : f32 to vector<8x128xf32>
    %88 = arith.maximumf %86, %87 : vector<8x128xf32>
    %89 = vector.broadcast %71 : i32 to vector<8x128xi32>
    %90 = arith.cmpi slt, %2, %89 : vector<8x128xi32>
    %91 = arith.select %90, %88, %69 : vector<8x128xi1>, vector<8x128xf32>
    %c4_i32 = arith.constant 4 : i32
    %92 = arith.index_cast %c4_i32 : i32 to index
    %93 = memref.load %arg1[%92] : memref<8xi32, #tpu.memory_space<smem>>
    %94 = arith.index_cast %c4_i32 : i32 to index
    %c0_12 = arith.constant 0 : index
    %c0_13 = arith.constant 0 : index
    %95 = vector.load %arg3[%94, %c0_12, %c0_13] : memref<8x8x128xf32, #tpu.memory_space<vmem>>, vector<1x8x128xf32>
    %96 = vector.shape_cast %95 : vector<1x8x128xf32> to vector<8x128xf32>
    %97 = vector.extract_strided_slice %91 {offsets = [0, 0], sizes = [1, 128], strides = [1, 1]} : vector<8x128xf32> to vector<1x128xf32>
    %98 = vector.extract_strided_slice %91 {offsets = [1, 0], sizes = [1, 128], strides = [1, 1]} : vector<8x128xf32> to vector<1x128xf32>
    %99 = vector.extract_strided_slice %91 {offsets = [2, 0], sizes = [1, 128], strides = [1, 1]} : vector<8x128xf32> to vector<1x128xf32>
    %100 = vector.broadcast %0 : f32 to vector<1x128xf32>
    %101 = arith.mulf %100, %97 : vector<1x128xf32>
    %102 = vector.broadcast %1 : f32 to vector<1x128xf32>
    %103 = arith.mulf %102, %97 : vector<1x128xf32>
    %104 = arith.addf %103, %98 : vector<1x128xf32>
    %105 = arith.subf %104, %99 : vector<1x128xf32>
    %106 = vector.extract_strided_slice %91 {offsets = [3, 0], sizes = [5, 128], strides = [1, 1]} : vector<8x128xf32> to vector<5x128xf32>
    %107 = tpu.concatenate %101, %105, %97, %106 in 0 : vector<1x128xf32>, vector<1x128xf32>, vector<1x128xf32>, vector<5x128xf32> -> vector<8x128xf32>
    %108 = arith.addf %96, %107 : vector<8x128xf32>
    %cst_14 = arith.constant 0.000000e+00 : f32
    %109 = vector.broadcast %cst_14 : f32 to vector<8x128xf32>
    %110 = arith.maximumf %108, %109 : vector<8x128xf32>
    %111 = vector.broadcast %93 : i32 to vector<8x128xi32>
    %112 = arith.cmpi slt, %2, %111 : vector<8x128xi32>
    %113 = arith.select %112, %110, %91 : vector<8x128xi1>, vector<8x128xf32>
    %c5_i32 = arith.constant 5 : i32
    %114 = arith.index_cast %c5_i32 : i32 to index
    %115 = memref.load %arg1[%114] : memref<8xi32, #tpu.memory_space<smem>>
    %116 = arith.index_cast %c5_i32 : i32 to index
    %c0_15 = arith.constant 0 : index
    %c0_16 = arith.constant 0 : index
    %117 = vector.load %arg3[%116, %c0_15, %c0_16] : memref<8x8x128xf32, #tpu.memory_space<vmem>>, vector<1x8x128xf32>
    %118 = vector.shape_cast %117 : vector<1x8x128xf32> to vector<8x128xf32>
    %119 = vector.extract_strided_slice %113 {offsets = [0, 0], sizes = [1, 128], strides = [1, 1]} : vector<8x128xf32> to vector<1x128xf32>
    %120 = vector.extract_strided_slice %113 {offsets = [1, 0], sizes = [1, 128], strides = [1, 1]} : vector<8x128xf32> to vector<1x128xf32>
    %121 = vector.extract_strided_slice %113 {offsets = [2, 0], sizes = [1, 128], strides = [1, 1]} : vector<8x128xf32> to vector<1x128xf32>
    %122 = vector.broadcast %0 : f32 to vector<1x128xf32>
    %123 = arith.mulf %122, %119 : vector<1x128xf32>
    %124 = vector.broadcast %1 : f32 to vector<1x128xf32>
    %125 = arith.mulf %124, %119 : vector<1x128xf32>
    %126 = arith.addf %125, %120 : vector<1x128xf32>
    %127 = arith.subf %126, %121 : vector<1x128xf32>
    %128 = vector.extract_strided_slice %113 {offsets = [3, 0], sizes = [5, 128], strides = [1, 1]} : vector<8x128xf32> to vector<5x128xf32>
    %129 = tpu.concatenate %123, %127, %119, %128 in 0 : vector<1x128xf32>, vector<1x128xf32>, vector<1x128xf32>, vector<5x128xf32> -> vector<8x128xf32>
    %130 = arith.addf %118, %129 : vector<8x128xf32>
    %cst_17 = arith.constant 0.000000e+00 : f32
    %131 = vector.broadcast %cst_17 : f32 to vector<8x128xf32>
    %132 = arith.maximumf %130, %131 : vector<8x128xf32>
    %133 = vector.broadcast %115 : i32 to vector<8x128xi32>
    %134 = arith.cmpi slt, %2, %133 : vector<8x128xi32>
    %135 = arith.select %134, %132, %113 : vector<8x128xi1>, vector<8x128xf32>
    %c6_i32 = arith.constant 6 : i32
    %136 = arith.index_cast %c6_i32 : i32 to index
    %137 = memref.load %arg1[%136] : memref<8xi32, #tpu.memory_space<smem>>
    %138 = arith.index_cast %c6_i32 : i32 to index
    %c0_18 = arith.constant 0 : index
    %c0_19 = arith.constant 0 : index
    %139 = vector.load %arg3[%138, %c0_18, %c0_19] : memref<8x8x128xf32, #tpu.memory_space<vmem>>, vector<1x8x128xf32>
    %140 = vector.shape_cast %139 : vector<1x8x128xf32> to vector<8x128xf32>
    %141 = vector.extract_strided_slice %135 {offsets = [0, 0], sizes = [1, 128], strides = [1, 1]} : vector<8x128xf32> to vector<1x128xf32>
    %142 = vector.extract_strided_slice %135 {offsets = [1, 0], sizes = [1, 128], strides = [1, 1]} : vector<8x128xf32> to vector<1x128xf32>
    %143 = vector.extract_strided_slice %135 {offsets = [2, 0], sizes = [1, 128], strides = [1, 1]} : vector<8x128xf32> to vector<1x128xf32>
    %144 = vector.broadcast %0 : f32 to vector<1x128xf32>
    %145 = arith.mulf %144, %141 : vector<1x128xf32>
    %146 = vector.broadcast %1 : f32 to vector<1x128xf32>
    %147 = arith.mulf %146, %141 : vector<1x128xf32>
    %148 = arith.addf %147, %142 : vector<1x128xf32>
    %149 = arith.subf %148, %143 : vector<1x128xf32>
    %150 = vector.extract_strided_slice %135 {offsets = [3, 0], sizes = [5, 128], strides = [1, 1]} : vector<8x128xf32> to vector<5x128xf32>
    %151 = tpu.concatenate %145, %149, %141, %150 in 0 : vector<1x128xf32>, vector<1x128xf32>, vector<1x128xf32>, vector<5x128xf32> -> vector<8x128xf32>
    %152 = arith.addf %140, %151 : vector<8x128xf32>
    %cst_20 = arith.constant 0.000000e+00 : f32
    %153 = vector.broadcast %cst_20 : f32 to vector<8x128xf32>
    %154 = arith.maximumf %152, %153 : vector<8x128xf32>
    %155 = vector.broadcast %137 : i32 to vector<8x128xi32>
    %156 = arith.cmpi slt, %2, %155 : vector<8x128xi32>
    %157 = arith.select %156, %154, %135 : vector<8x128xi1>, vector<8x128xf32>
    %c7_i32 = arith.constant 7 : i32
    %158 = arith.index_cast %c7_i32 : i32 to index
    %159 = memref.load %arg1[%158] : memref<8xi32, #tpu.memory_space<smem>>
    %160 = arith.index_cast %c7_i32 : i32 to index
    %c0_21 = arith.constant 0 : index
    %c0_22 = arith.constant 0 : index
    %161 = vector.load %arg3[%160, %c0_21, %c0_22] : memref<8x8x128xf32, #tpu.memory_space<vmem>>, vector<1x8x128xf32>
    %162 = vector.shape_cast %161 : vector<1x8x128xf32> to vector<8x128xf32>
    %163 = vector.extract_strided_slice %157 {offsets = [0, 0], sizes = [1, 128], strides = [1, 1]} : vector<8x128xf32> to vector<1x128xf32>
    %164 = vector.extract_strided_slice %157 {offsets = [1, 0], sizes = [1, 128], strides = [1, 1]} : vector<8x128xf32> to vector<1x128xf32>
    %165 = vector.extract_strided_slice %157 {offsets = [2, 0], sizes = [1, 128], strides = [1, 1]} : vector<8x128xf32> to vector<1x128xf32>
    %166 = vector.broadcast %0 : f32 to vector<1x128xf32>
    %167 = arith.mulf %166, %163 : vector<1x128xf32>
    %168 = vector.broadcast %1 : f32 to vector<1x128xf32>
    %169 = arith.mulf %168, %163 : vector<1x128xf32>
    %170 = arith.addf %169, %164 : vector<1x128xf32>
    %171 = arith.subf %170, %165 : vector<1x128xf32>
    %172 = vector.extract_strided_slice %157 {offsets = [3, 0], sizes = [5, 128], strides = [1, 1]} : vector<8x128xf32> to vector<5x128xf32>
    %173 = tpu.concatenate %167, %171, %163, %172 in 0 : vector<1x128xf32>, vector<1x128xf32>, vector<1x128xf32>, vector<5x128xf32> -> vector<8x128xf32>
    %174 = arith.addf %162, %173 : vector<8x128xf32>
    %cst_23 = arith.constant 0.000000e+00 : f32
    %175 = vector.broadcast %cst_23 : f32 to vector<8x128xf32>
    %176 = arith.maximumf %174, %175 : vector<8x128xf32>
    %177 = vector.broadcast %159 : i32 to vector<8x128xi32>
    %178 = arith.cmpi slt, %2, %177 : vector<8x128xi32>
    %179 = arith.select %178, %176, %157 : vector<8x128xi1>, vector<8x128xf32>
    %c8_i32 = arith.constant 8 : i32
    %c0_24 = arith.constant 0 : index
    %c0_25 = arith.constant 0 : index
    %180 = vector.load %arg4[%c0_24, %c0_25] : memref<8x128xf32, #tpu.memory_space<vmem>>, vector<8x128xf32>
    tpu.vector_store %arg4[%c0_24, %c0_25], %179 {strides = array<i32>} : memref<8x128xf32, #tpu.memory_space<vmem>>, vector<8x128xf32>,
    return
  }
  func.func @transform_0(%arg0: i32) -> i32 {
    %c0_i32 = arith.constant 0 : i32
    %c0_i32_0 = arith.constant 0 : i32
    return %c0_i32 : i32
  }
  func.func @transform_1(%arg0: i32) -> i32 {
    %c0_i32 = arith.constant 0 : i32
    %c0_i32_0 = arith.constant 0 : i32
    return %c0_i32 : i32
  }
  func.func @transform_2(%arg0: i32) -> (i32, i32, i32) {
    %c0_i32 = arith.constant 0 : i32
    %c0_i32_0 = arith.constant 0 : i32
    %c0_i32_1 = arith.constant 0 : i32
    %c0_i32_2 = arith.constant 0 : i32
    return %c0_i32, %c0_i32_0, %c0_i32_1 : i32, i32, i32
  }
  func.func @transform_3(%arg0: i32) -> (i32, i32) {
    %c0_i32 = arith.constant 0 : i32
    %c0_i32_0 = arith.constant 0 : i32
    %c0_i32_1 = arith.constant 0 : i32
    return %c0_i32, %c0_i32_0 : i32, i32
  }
}

</mosaic_0001>

<bundles_post_ra>
// kernel: tpu_custom_call.1
= control target key start
LH: loop header
LB: loop body
LE: loop exit
PB: predicated region body
PF: predicated region fallthrough
CT: control target
= control target key end

     0   :  { %8 = vsyncpa [#allocation5], 0  ;;  %s474_s0 = inlined_call_operand.hbm [shape: s32[8], index: 0, kind: input, shape index: {}]   ;;  %s475_s1 = inlined_call_operand.vmem [shape: f32[2], index: 1, kind: input, shape index: {}]   ;;  %s476_s2 = inlined_call_operand.hbm [shape: f32[8,8,128], index: 2, kind: input, shape index: {}]   ;;  %s477_s3 = inlined_call_operand.hbm [shape: f32[8,128], index: 3, kind: output, shape index: {}]  }
   0x1   :  { %9 = vsyncpa [#allocation6], 0 }
   0x2   :  { %10 = vsyncpa [#allocation3], 0 }
   0x3   :  { %11 = vsyncpa [#allocation4], 0  ;;  %s26_s14 = sshll.u32 %s475_s1, 4  ;;  %s281_s17 = scalar_lea.hbm %s474_s0, 16  ;;  %s27_s14 = int_to_ptr.vmem [resolvable:$true] %s26_s14 }
   0x4   :  { %p282_p0 = scmp.ne.s32.totalorder %s474_s0, %s281_s17  ;;  %p285_p1 = scmp.lt.u32.totalorder %s281_s17, %s474_s0 }
   0x6   :  { %p287_p2 = pnand %p285_p1, %p282_p0 }
   0x8   :  { %290 = shalt.err (!%p287_p2)
}
   0x9   :  { %s355_s22 = smov [#allocation2]   ;;  %s291_s1 = scalar_lea.vmem %s27_s14, 16 }
   0xa   :  { %19 = dma.hbm_to_smem %s474_s0, 16, %s355_s22, [#allocation5]  }
   0xb   :  { %p292_p3 = scmp.ne.s32.totalorder %s27_s14, %s291_s1  ;;  %p296_p4 = scmp.lt.s32.totalorder %s27_s14, %s27_s14 }
   0xc   :  { %p297_p5 = scmp.lt.s32.totalorder %s291_s1, %s291_s1 }
   0xe   :  { %p298_p6 = por %p297_p5, %p296_p4 }
  0x10   :  { %p299_p7 = pnand %p298_p6, %p292_p3 }
  0x12   :  { %302 = shalt.err (!%p299_p7)
}
  0x13   :  { %s356_s25 = smov [#allocation7]   ;;  %s357_s26 = smov [#allocation8]  }
  0x14   :  { %29 = dma.vmem_to_smem %s27_s14, 16, %s356_s25, [#allocation6]  }
  0x15   :  { %s35_s27 = sshll.u32 %s357_s26, 4  ;;  %s303_s30 = scalar_lea.hbm %s476_s2, 1024  ;;  %s36_s27 = int_to_ptr.vmem [resolvable:$true] %s35_s27 }
  0x16   :  { %p304_p8 = scmp.ne.s32.totalorder %s476_s2, %s303_s30  ;;  %p307_p9 = scmp.lt.u32.totalorder %s303_s30, %s476_s2 }
  0x18   :  { %p309_p10 = pnand %p307_p9, %p304_p8 }
  0x1a   :  { %312 = shalt.err (!%p309_p10)
}
  0x1b   :  { %s313_s7 = scalar_lea.vmem %s36_s27, 1024  ;;  %p318_p12 = scmp.lt.s32.totalorder %s36_s27, %s36_s27 }
  0x1c   :  { %p314_p11 = scmp.ne.s32.totalorder %s36_s27, %s313_s7  ;;  %p319_p13 = scmp.lt.s32.totalorder %s313_s7, %s313_s7 }
  0x1e   :  { %p320_p0 = por %p319_p13, %p318_p12 }
  0x20   :  { %p321_p1 = pnand %p320_p0, %p314_p11 }
  0x22   :  { %324 = shalt.err (!%p321_p1)
}
  0x23   :  { %s358_s8 = smov 128   ;;  %s359_s9 = smov 8  }
  0x24   :  { %41 = dma.hbm_to_vmem [thread:$0]  %s476_s2, 1024, %s36_s27, [#allocation3], %s358_s8, %s358_s8, %s359_s9  }
  0x25   :  { %347 = dma.done.wait [#allocation5], 16  }
  0x26   :  { %348 = vsyncadd [#allocation5], 4294967280 }
  0x27   :  { %349 = dma.done.wait [#allocation6], 16  }
  0x28   :  { %350 = vsyncadd [#allocation6], 4294967280 }
  0x29   :  { %351 = dma.done.wait [#allocation3], 1024  }
  0x2a   :  { %352 = vsyncadd [#allocation3], 4294966272 }
  0x2b   :  { %51 = sfence }
  0x2c   :  { %s52_s12 = sld [smem:[#allocation7]]  ;;  %s267_s13 = sld [smem:[#allocation7 + $0x1]]  ;;  %v54_v0 = vlaneseq  ;;  %vm63_vm0 = vcmask 1040384   ;;  %vm65_vm1 = vcmask 1041408   ;;  %vm67_vm2 = vcmask 1042432   ;;  %v57_v6 = vld [vmem:[#allocation8] sm:$0xff] }
  0x2d   :  { %s56_s14 = sld [smem:[#allocation2]]  ;;  %s268_s2 = sld [smem:[#allocation2 + $0x1]]  ;;  %v76_v22 = vld [vmem:[#allocation8 + $0x8] sm:$0xff]  ;;  %v101_v38 = vld [vmem:[#allocation8 + $0x10] sm:$0xff]  ;;  %v126_v54 = vld [vmem:[#allocation8 + $0x18] sm:$0xff] }
  0x2e   :  { %v414_v5 = vand.u32 127, %v54_v0  ;;  %s269_s15 = sld [smem:[#allocation2 + $0x2]]  ;;  %s270_s16 = sld [smem:[#allocation2 + $0x3]] }
  0x2f   :  { %s271_s17 = sld [smem:[#allocation2 + $0x4]]  ;;  %s272_s18 = sld [smem:[#allocation2 + $0x5]] }
  0x30   :  { %s273_s19 = sld [smem:[#allocation2 + $0x6]]  ;;  %s274_s20 = sld [smem:[#allocation2 + $0x7]] }
  0x31   :  { %s360_s21 = smov [#allocation9]  }
  0x32   :  { %v408_v1 = vstv %s52_s12  ;;  %v410_v2 = vstv %s267_s13  ;;  %s256_s22 = sshll.u32 %s360_s21, 4  ;;  %s257_s22 = int_to_ptr.vmem [resolvable:$true] %s256_s22 }
  0x33   :  { %v59_v3 = vmul.f32 0.0, %v408_v1  ;;  %v61_v4 = vmul.f32 0.0, %v410_v2  ;;  %v71_v9 = vstv %s56_s14  ;;  %v96_v25 = vstv %s268_s2  ;;  %s325_s23 = scalar_lea.vmem %s257_s22, 128  ;;  %p330_p3 = scmp.lt.s32.totalorder %s257_s22, %s257_s22 }
  0x34   :  { %vm72_vm3 = vcmp.lt.s32.totalorder %v414_v5, %v71_v9  ;;  %vm97_vm4 = vcmp.lt.s32.totalorder %v414_v5, %v96_v25  ;;  %v121_v41 = vstv %s269_s15  ;;  %v146_v57 = vstv %s270_s16  ;;  %v151_v9 = vld [vmem:[#allocation8 + $0x20] sm:$0xff]  ;;  %v176_v25 = vld [vmem:[#allocation8 + $0x28] sm:$0xff]  ;;  %p326_p2 = scmp.ne.s32.totalorder %s257_s22, %s325_s23  ;;  %p331_p4 = scmp.lt.s32.totalorder %s325_s23, %s325_s23 }
  0x35   :  { %v64_v7 = vsel %vm63_vm0, %v59_v3, %v61_v4  ;;  %vm122_vm5 = vcmp.lt.s32.totalorder %v414_v5, %v121_v41  ;;  %vm147_vm6 = vcmp.lt.s32.totalorder %v414_v5, %v146_v57  ;;  %v201_v41 = vld [vmem:[#allocation8 + $0x30] sm:$0xff]  ;;  %v226_v57 = vld [vmem:[#allocation8 + $0x38] sm:$0xff] }
  0x36   :  { %v66_v8 = vsel %vm65_vm1, %v64_v7, 0.0  ;;  %p332_p5 = por %p331_p4, %p330_p3 }
  0x37   :  { %v68_v10 = vsel %vm67_vm2, %v66_v8, 0.0 }
  0x38   :  { %v69_v11 = vadd.f32 %v68_v10, %v57_v6  ;;  %p333_p6 = pnand %p332_p5, %p326_p2 }
  0x3a   :  { %v70_v12 = vmax.f32 %v69_v11, 0.0 }
  0x3c   :  { %v73_v13 = vsel %vm72_vm3, %v70_v12, 0.0  ;;  %v171_v12 = vstv %s271_s17 }
  0x3d   :  { %v78_v14 = vmul.f32 %v73_v13, %v410_v2  ;;  %v80_v15 = vrot.slane %v73_v13, 1  ;;  %v83_v16 = vrot.slane %v73_v13, 2  ;;  %v77_v18 = vmul.f32 %v73_v13, %v408_v1 }
  0x3e   :  { %v89_v20 = vrot.slane %v73_v13, 6  ;;  %vm172_vm7 = vcmp.lt.s32.totalorder %v414_v5, %v171_v12 }
  0x3f   :  { %v82_v17 = vadd.f32 %v80_v15, %v78_v14 }
  0x41   :  { %v85_v19 = vsub.f32 %v82_v17, %v83_v16 }
  0x43   :  { %v87_v21 = vrot.slane %v85_v19, 7 }
  0x45   :  { %v91_v23 = vsel %vm63_vm0, %v77_v18, %v87_v21 }
  0x46   :  { %v92_v24 = vsel %vm65_vm1, %v91_v23, %v89_v20 }
  0x47   :  { %v93_v26 = vsel %vm67_vm2, %v92_v24, %v73_v13 }
  0x48   :  { %v94_v27 = vadd.f32 %v93_v26, %v76_v22 }
  0x4a   :  { %v95_v28 = vmax.f32 %v94_v27, 0.0 }
  0x4c   :  { %v98_v29 = vsel %vm97_vm4, %v95_v28, %v73_v13  ;;  %v196_v28 = vstv %s272_s18 }
  0x4d   :  { %v103_v30 = vmul.f32 %v98_v29, %v410_v2  ;;  %v105_v31 = vrot.slane %v98_v29, 1  ;;  %v108_v32 = vrot.slane %v98_v29, 2  ;;  %v102_v34 = vmul.f32 %v98_v29, %v408_v1 }
  0x4e   :  { %v114_v36 = vrot.slane %v98_v29, 6  ;;  %vm197_vm8 = vcmp.lt.s32.totalorder %v414_v5, %v196_v28 }
  0x4f   :  { %v107_v33 = vadd.f32 %v105_v31, %v103_v30 }
  0x51   :  { %v110_v35 = vsub.f32 %v107_v33, %v108_v32 }
  0x53   :  { %v112_v37 = vrot.slane %v110_v35, 7 }
  0x55   :  { %v116_v39 = vsel %vm63_vm0, %v102_v34, %v112_v37 }
  0x56   :  { %v117_v40 = vsel %vm65_vm1, %v116_v39, %v114_v36 }
  0x57   :  { %v118_v42 = vsel %vm67_vm2, %v117_v40, %v98_v29 }
  0x58   :  { %v119_v43 = vadd.f32 %v118_v42, %v101_v38 }
  0x5a   :  { %v120_v44 = vmax.f32 %v119_v43, 0.0 }
  0x5c   :  { %v123_v45 = vsel %vm122_vm5, %v120_v44, %v98_v29  ;;  %v221_v44 = vstv %s273_s19 }
  0x5d   :  { %v128_v46 = vmul.f32 %v123_v45, %v410_v2  ;;  %v130_v47 = vrot.slane %v123_v45, 1  ;;  %v133_v48 = vrot.slane %v123_v45, 2  ;;  %v127_v50 = vmul.f32 %v123_v45, %v408_v1 }
  0x5e   :  { %v139_v52 = vrot.slane %v123_v45, 6  ;;  %vm222_vm9 = vcmp.lt.s32.totalorder %v414_v5, %v221_v44 }
  0x5f   :  { %v132_v49 = vadd.f32 %v130_v47, %v128_v46 }
  0x61   :  { %v135_v51 = vsub.f32 %v132_v49, %v133_v48 }
  0x63   :  { %v137_v53 = vrot.slane %v135_v51, 7 }
  0x65   :  { %v141_v55 = vsel %vm63_vm0, %v127_v50, %v137_v53 }
  0x66   :  { %v142_v56 = vsel %vm65_vm1, %v141_v55, %v139_v52 }
  0x67   :  { %v143_v58 = vsel %vm67_vm2, %v142_v56, %v123_v45 }
  0x68   :  { %v144_v59 = vadd.f32 %v143_v58, %v126_v54 }
  0x6a   :  { %v145_v60 = vmax.f32 %v144_v59, 0.0 }
  0x6c   :  { %v148_v61 = vsel %vm147_vm6, %v145_v60, %v123_v45  ;;  %v246_v60 = vstv %s274_s20 }
  0x6d   :  { %v153_v62 = vmul.f32 %v148_v61, %v410_v2  ;;  %v155_v63 = vrot.slane %v148_v61, 1  ;;  %v158_v0 = vrot.slane %v148_v61, 2  ;;  %v152_v4 = vmul.f32 %v148_v61, %v408_v1 }
  0x6e   :  { %v164_v7 = vrot.slane %v148_v61, 6  ;;  %vm247_vm10 = vcmp.lt.s32.totalorder %v414_v5, %v246_v60 }
  0x6f   :  { %v157_v3 = vadd.f32 %v155_v63, %v153_v62 }
  0x71   :  { %v160_v6 = vsub.f32 %v157_v3, %v158_v0 }
  0x73   :  { %v162_v8 = vrot.slane %v160_v6, 7 }
  0x75   :  { %v166_v10 = vsel %vm63_vm0, %v152_v4, %v162_v8 }
  0x76   :  { %v167_v11 = vsel %vm65_vm1, %v166_v10, %v164_v7 }
  0x77   :  { %v168_v13 = vsel %vm67_vm2, %v167_v11, %v148_v61 }
  0x78   :  { %v169_v14 = vadd.f32 %v168_v13, %v151_v9 }
  0x7a   :  { %v170_v15 = vmax.f32 %v169_v14, 0.0 }
  0x7c   :  { %v173_v16 = vsel %vm172_vm7, %v170_v15, %v148_v61 }
  0x7d   :  { %v178_v17 = vmul.f32 %v173_v16, %v410_v2  ;;  %v180_v18 = vrot.slane %v173_v16, 1  ;;  %v183_v19 = vrot.slane %v173_v16, 2  ;;  %v177_v21 = vmul.f32 %v173_v16, %v408_v1 }
  0x7e   :  { %v189_v23 = vrot.slane %v173_v16, 6 }
  0x7f   :  { %v182_v20 = vadd.f32 %v180_v18, %v178_v17 }
  0x81   :  { %v185_v22 = vsub.f32 %v182_v20, %v183_v19 }
  0x83   :  { %v187_v24 = vrot.slane %v185_v22, 7 }
  0x85   :  { %v191_v26 = vsel %vm63_vm0, %v177_v21, %v187_v24 }
  0x86   :  { %v192_v27 = vsel %vm65_vm1, %v191_v26, %v189_v23 }
  0x87   :  { %v193_v29 = vsel %vm67_vm2, %v192_v27, %v173_v16 }
  0x88   :  { %v194_v30 = vadd.f32 %v193_v29, %v176_v25 }
  0x8a   :  { %v195_v31 = vmax.f32 %v194_v30, 0.0 }
  0x8c   :  { %v198_v32 = vsel %vm197_vm8, %v195_v31, %v173_v16 }
  0x8d   :  { %v203_v33 = vmul.f32 %v198_v32, %v410_v2  ;;  %v205_v34 = vrot.slane %v198_v32, 1  ;;  %v208_v35 = vrot.slane %v198_v32, 2  ;;  %v202_v37 = vmul.f32 %v198_v32, %v408_v1 }
  0x8e   :  { %v214_v39 = vrot.slane %v198_v32, 6 }
  0x8f   :  { %v207_v36 = vadd.f32 %v205_v34, %v203_v33 }
  0x91   :  { %v210_v38 = vsub.f32 %v207_v36, %v208_v35 }
  0x93   :  { %v212_v40 = vrot.slane %v210_v38, 7 }
  0x95   :  { %v216_v42 = vsel %vm63_vm0, %v202_v37, %v212_v40 }
  0x96   :  { %v217_v43 = vsel %vm65_vm1, %v216_v42, %v214_v39 }
  0x97   :  { %v218_v45 = vsel %vm67_vm2, %v217_v43, %v198_v32 }
  0x98   :  { %v219_v46 = vadd.f32 %v218_v45, %v201_v41 }
  0x9a   :  { %v220_v47 = vmax.f32 %v219_v46, 0.0 }
  0x9c   :  { %v223_v48 = vsel %vm222_vm9, %v220_v47, %v198_v32 }
  0x9d   :  { %v228_v49 = vmul.f32 %v223_v48, %v410_v2  ;;  %v230_v50 = vrot.slane %v223_v48, 1  ;;  %v233_v51 = vrot.slane %v223_v48, 2  ;;  %v227_v53 = vmul.f32 %v223_v48, %v408_v1 }
  0x9e   :  { %v239_v55 = vrot.slane %v223_v48, 6 }
  0x9f   :  { %v232_v52 = vadd.f32 %v230_v50, %v228_v49 }
  0xa1   :  { %v235_v54 = vsub.f32 %v232_v52, %v233_v51 }
  0xa3   :  { %v237_v56 = vrot.slane %v235_v54, 7 }
  0xa5   :  { %v241_v58 = vsel %vm63_vm0, %v227_v53, %v237_v56 }
  0xa6   :  { %v242_v59 = vsel %vm65_vm1, %v241_v58, %v239_v55 }
  0xa7   :  { %v243_v61 = vsel %vm67_vm2, %v242_v59, %v223_v48 }
  0xa8   :  { %v244_v62 = vadd.f32 %v243_v61, %v226_v57 }
  0xaa   :  { %v245_v2 = vmax.f32 %v244_v62, 0.0 }
  0xac   :  { %v248_v63 = vsel %vm247_vm10, %v245_v2, %v223_v48 }
  0xad   :  { %249 = vst [vmem:[#allocation9] sm:$0xff] %v248_v63 }
  0xae   :  { %336 = shalt.err (!%p333_p6)
}
  0xaf   :  { %s337_s25 = scalar_lea.hbm %s477_s3, 128 }
  0xb0   :  { %p338_p7 = scmp.ne.s32.totalorder %s477_s3, %s337_s25  ;;  %p341_p8 = scmp.lt.u32.totalorder %s337_s25, %s477_s3 }
  0xb2   :  { %p343_p9 = pnand %p341_p8, %p338_p7 }
  0xb4   :  { %346 = shalt.err (!%p343_p9)
}
  0xb5   :  { %259 = dma.vmem_to_hbm [thread:$0]  %s257_s22, 128, %s477_s3, [#allocation4]  }
  0xb6   :  { %353 = dma.done.wait [#allocation4], 128  }
  0xb7   :  { %354 = vsyncadd [#allocation4], 4294967168 }
  0xb8   :  { %263 = vsyncpa [#allocation3], 1 }
  0xb9   :  { %264 = vsyncpa [#allocation4], 1 }
  0xba   :  { %265 = vsyncpa [#allocation5], 1 }
  0xbb   :  { %266 = vsyncpa [#allocation6], 1 }

</bundles_post_ra>
